<compile_context>
chip_gen: v6e
topology: v6e:2x2x1
jax: 0.10.0
libtpu: 0.0.40
codegen_flags: <defaults>
</compile_context>

<pallas_src>
import functools

import jax
import jax.numpy as jnp
from jax import lax
from jax.experimental import pallas as pl
from jax.experimental.pallas import tpu as pltpu

LANES = 128
SUBLANES = 8
CHUNK_ROWS = 1024                    # in-kernel compute chunk (0.5 MiB f32 temporaries)
TILE_BYTE_BUDGET = 8 * 1024 * 1024   # both input tiles, one pipeline buffer
VMEM_LIMIT_BYTES = 40 * 1024 * 1024  # 16 MiB double-buffered I/O + chunked temps + headroom


def _round_up(x, m):
    return ((x + m - 1) // m) * m


def _num_tensorcores():
    """2 only where one Pallas kernel spans 2 TensorCores (v7x); v5e/v6e are
    1 TC/chip and a fake 'parallel' axis there would just duplicate work."""
    try:
        kind = (jax.devices()[0].device_kind or "").lower()
    except Exception:
        return 1
    return 2 if "v7" in kind else 1


def _sublane_align(*dtypes):
    """Sublane alignment that satisfies the min-tile rule for every dtype
    (f32 -> 8, bf16 -> 16, int8 -> 32)."""
    a = SUBLANES
    for d in dtypes:
        a = max(a, SUBLANES * max(1, 4 // jnp.dtype(d).itemsize))
    return a


def _focal_loss_kernel(gamma, binary_targets, rows, tile_rows, chunk_rows,
                       tiles_per_core, p_ref, t_ref, out_ref, acc_ref):
    c = pl.program_id(0)                 # TensorCore ("parallel") axis
    i = pl.program_id(1)                 # reduction ("arbitrary") axis: row tiles
    tile_idx = c * tiles_per_core + i    # un-clamped logical tile index

    @pl.when(i == 0)
    def _():
        acc_ref[...] = jnp.zeros_like(acc_ref)

    def chunk_loss(p, t):
        # Cast to f32 in VMEM (inputs may arrive bf16/int8 at lower HBM cost).
        p = p.astype(jnp.float32)
        t = t.astype(jnp.float32)
        if binary_targets:
            # t in {0,1}: one log per element instead of 2 logs + 1 exp.
            pt = jnp.where(t > 0.5, p, 1.0 - p)
            bce = -jnp.maximum(jnp.log(pt), -100.0)
            omp = 1.0 - pt
        else:
            # F.binary_cross_entropy(reduction='none') with PyTorch's -100 log
            # clamp; clamp happens before the multiply so 0*(-100) != inf*0.
            log_p = jnp.maximum(jnp.log(p), -100.0)
            log_1mp = jnp.maximum(jnp.log(1.0 - p), -100.0)
            bce = -(t * log_p + (1.0 - t) * log_1mp)
            pt = jnp.exp(-bce)
            omp = 1.0 - pt
        # Integer gamma -> repeated VPU multiplies instead of pow (= exp(g*log)).
        if gamma == 2.0:
            w = omp * omp
        elif gamma == 1.0:
            w = omp
        elif gamma == 0.0:
            w = jnp.ones_like(omp)
        elif float(gamma).is_integer() and 0.0 < gamma <= 8.0:
            w = omp
            for _ in range(int(gamma) - 1):
                w = w * omp
        else:
            w = omp ** gamma
        # NOTE: alpha is a *scalar* in this module and is applied to the final
        # sum in the wrapper; a per-class alpha would NOT factor out like this.
        return w * bce

    n_chunks = tile_rows // chunk_rows

    @pl.loop(0, n_chunks)
    def _(ci):
        start = pl.multiple_of(ci * chunk_rows, chunk_rows)
        f_loss = chunk_loss(p_ref[pl.ds(start, chunk_rows), :],
                            t_ref[pl.ds(start, chunk_rows), :])

        def accumulate(x):
            # VPU-only per-vreg accumulation into the (8,128) f32 scratch.
            # (f32 serial accumulation; fine for n up to ~1e8 at 1e-5 rtol.)
            acc_ref[...] += jnp.sum(
                x.reshape(chunk_rows // SUBLANES, SUBLANES, LANES), axis=0)

        # Row-granular validity: the <128-element tail is handled outside the
        # kernel, so lane masking is never needed and indices stay well inside
        # int32 range.  Interior chunks skip the mask entirely.
        row0 = tile_idx * tile_rows + start
        boundary = row0 + chunk_rows > rows   # last real chunk or overhang dup

        @pl.when(jnp.logical_not(boundary))
        def _():
            accumulate(f_loss)

        @pl.when(boundary)
        def _():
            row = lax.broadcasted_iota(jnp.int32, f_loss.shape, 0)
            accumulate(jnp.where(row0 + row < rows, f_loss, 0.0))

    @pl.when(i == pl.num_programs(1) - 1)
    def _():
        # Single cross-lane (XLU) reduce + SMEM scalar store, once per core.
        out_ref[0, 0] = jnp.sum(acc_ref[...])


def _focal_elementwise(p, t, gamma):
    """Plain-JAX per-element focal loss (reference math / ragged tail)."""
    p = p.astype(jnp.float32)
    t = t.astype(jnp.float32)
    log_p = jnp.maximum(jnp.log(p), -100.0)
    log_1mp = jnp.maximum(jnp.log(1.0 - p), -100.0)
    bce = -(t * log_p + (1.0 - t) * log_1mp)
    pt = jnp.exp(-bce)
    return (1.0 - pt) ** gamma * bce


def focal_loss(inputs, targets, alpha=1.0, gamma=2.0, binary_targets=False):
    """Equivalent of FocalLoss(alpha, gamma, logits=False,
    reduction='elementwise_mean').forward(inputs, targets).

    binary_targets=True enables the faster in-kernel path (1 transcendental per
    element instead of 3); it is only valid when every target is exactly 0/1.
    """
    assert inputs.shape == targets.shape
    n = inputs.size
    assert n > 0

    p_flat = jnp.ravel(inputs)   # contiguous reshape: no copy, no wrapper astype
    t_flat = jnp.ravel(targets)

    rem = n % LANES
    n_main = n - rem
    tail_sum = jnp.float32(0.0)
    if rem:
        # <=127-element ragged tail computed in plain JAX (negligible) instead
        # of materializing a padded copy of both inputs for the kernel.
        tail_sum = jnp.sum(_focal_elementwise(p_flat[n_main:], t_flat[n_main:],
                                              gamma))
        if n_main == 0:
            return jnp.float32(alpha) * tail_sum / jnp.float32(n)
        # TODO(synk): this prefix slice still costs one extra HBM pass when
        # n % 128 != 0; arrange 128-multiple sizes upstream for zero-copy.
        p_flat = p_flat[:n_main]
        t_flat = t_flat[:n_main]

    rows = n_main // LANES
    p2d = p_flat.reshape(rows, LANES)
    t2d = t_flat.reshape(rows, LANES)

    # Tile sizing: ~TILE_BYTE_BUDGET of input per grid step (both operands, one
    # pipeline buffer) -> ~2x that double-buffered, amortizing the ~0.35 us/step
    # grid overhead.  For f32+f32 this is 8192 rows (4 MiB/input/step).
    align = _sublane_align(p2d.dtype, t2d.dtype)
    per_row_bytes = LANES * (p2d.dtype.itemsize + t2d.dtype.itemsize)
    tr = max(align, (TILE_BYTE_BUDGET // per_row_bytes) // align * align)
    tr = min(tr, _round_up(rows, align))
    if tr >= CHUNK_ROWS:
        tr = (tr // CHUNK_ROWS) * CHUNK_ROWS   # whole number of compute chunks
        chunk = CHUNK_ROWS
    else:
        chunk = tr

    nt = pl.cdiv(rows, tr)                 # row tiles (reduction steps)
    ncores = min(_num_tensorcores(), nt)   # 2 only on multi-TC chips (v7x)
    tpc = pl.cdiv(nt, ncores)              # row tiles per core

    def in_map(c, i):
        # Clamp so the second core's overhang steps re-read a valid tile; their
        # contribution is zeroed by the in-kernel row mask.
        return (jnp.minimum(c * tpc + i, nt - 1), 0)

    kernel = functools.partial(_focal_loss_kernel, float(gamma),
                               bool(binary_targets), rows, tr, chunk, tpc)

    partial_sums = pl.pallas_call(
        kernel,
        out_shape=jax.ShapeDtypeStruct((ncores, 1), jnp.float32),
        grid=(ncores, tpc),
        in_specs=[
            pl.BlockSpec((tr, LANES), in_map),
            pl.BlockSpec((tr, LANES), in_map),
        ],
        out_specs=pl.BlockSpec((1, 1), lambda c, i: (c, 0),
                               memory_space=pltpu.MemorySpace.SMEM),
        scratch_shapes=[pltpu.VMEM((SUBLANES, LANES), jnp.float32)],
        compiler_params=pltpu.CompilerParams(
            dimension_semantics=("parallel", "arbitrary"),
            vmem_limit_bytes=VMEM_LIMIT_BYTES),
    )(p2d, t2d)

    # reduction='elementwise_mean' -> mean over all (real) elements; scalar
    # alpha factors out of the sum.
    total = jnp.sum(partial_sums) + tail_sum
    return jnp.float32(alpha) * total / jnp.float32(n)


def focal_loss_ref(inputs, targets, alpha=1.0, gamma=2.0):
    f = _focal_elementwise(jnp.ravel(inputs), jnp.ravel(targets), gamma)
    return jnp.float32(alpha) * jnp.mean(f)


if __name__ == "__main__":
    key = jax.random.PRNGKey(0)
    k1, k2 = jax.random.split(key)

    # NCHW example, matching a typical dense-prediction focal-loss use.
    shape = (2, 4, 16, 16)
    # logits=False in the module => inputs are probabilities in (0, 1).
    inputs = jax.nn.sigmoid(jax.random.normal(k1, shape, dtype=jnp.float32))
    targets = jax.random.bernoulli(k2, 0.5, shape).astype(jnp.float32)

    ref = focal_loss_ref(inputs, targets, alpha=1.0, gamma=2.0)

    # General (soft-target capable) path.
    out = jax.block_until_ready(focal_loss(inputs, targets, alpha=1.0, gamma=2.0))
    assert jnp.allclose(out, ref, rtol=1e-5, atol=1e-6), (out, ref)

    # Binary-target fast path (1 transcendental / element).
    out_bin = jax.block_until_ready(
        focal_loss(inputs, targets, alpha=1.0, gamma=2.0, binary_targets=True))
    assert jnp.allclose(out_bin, ref, rtol=1e-5, atol=1e-6), (out_bin, ref)

    # Narrow-dtype inputs (bf16) stream at half the HBM cost; kernel upcasts.
    inputs_bf16 = inputs.astype(jnp.bfloat16)
    targets_bf16 = targets.astype(jnp.bfloat16)
    ref_bf16 = focal_loss_ref(inputs_bf16, targets_bf16, alpha=1.0, gamma=2.0)
    out_bf16 = jax.block_until_ready(
        focal_loss(inputs_bf16, targets_bf16, alpha=1.0, gamma=2.0,
                   binary_targets=True))
    assert jnp.allclose(out_bf16, ref_bf16, rtol=1e-5, atol=1e-6), (out_bf16, ref_bf16)

    print("KERNEL_OK")
</pallas_src>

<mosaic_0001>
module attributes {stable_mosaic.version = 11 : i64} {
  func.func @_focal_loss_kernel(%arg0: i32, %arg1: i32, %arg2: memref<16x128xf32, #tpu.memory_space<vmem>>, %arg3: memref<16x128xf32, #tpu.memory_space<vmem>>, %arg4: memref<1x1xf32, #tpu.memory_space<smem>>, %arg5: memref<8x128xf32, #tpu.memory_space<vmem>>) attributes {dimension_semantics = [#tpu.dimension_semantics<parallel>, #tpu.dimension_semantics<arbitrary>], iteration_bounds = array<i64: 1, 1>, scalar_prefetch = 0 : i64, scratch_operands = 1 : i64, tpu.core_type = #tpu.core_type<tc>, window_params = [{transform_indices = @transform_0, window_bounds = array<i64: 16, 128>}, {transform_indices = @transform_1, window_bounds = array<i64: 16, 128>}, {transform_indices = @transform_2, window_bounds = array<i64: 1, 1>}]} {
    %c1_i32 = arith.constant 1 : i32
    %0 = arith.muli %arg0, %c1_i32 : i32
    %1 = arith.addi %0, %arg1 : i32
    %c0_i32 = arith.constant 0 : i32
    %2 = arith.cmpi eq, %arg1, %c0_i32 : i32
    %3 = arith.extui %2 : i1 to i32
    %c0_i32_0 = arith.constant 0 : i32
    %4 = arith.cmpi ne, %3, %c0_i32_0 : i32
    scf.if %4 {
      %cst_19 = arith.constant 0.000000e+00 : f32
      %47 = vector.broadcast %cst_19 : f32 to vector<8x128xf32>
      %c0_20 = arith.constant 0 : index
      %c0_21 = arith.constant 0 : index
      %48 = vector.load %arg5[%c0_20, %c0_21] : memref<8x128xf32, #tpu.memory_space<vmem>>, vector<8x128xf32>
      tpu.vector_store %arg5[%c0_20, %c0_21], %47 {strides = array<i32>} : memref<8x128xf32, #tpu.memory_space<vmem>>, vector<8x128xf32>,
    } else {
    }
    %c0_i32_1 = arith.constant 0 : i32
    %c1_i32_2 = arith.constant 1 : i32
    %5 = arith.muli %c0_i32_1, %c1_i32_2 : i32
    %c0_i32_3 = arith.constant 0 : i32
    %6 = arith.addi %c0_i32_3, %5 : i32
    %c16_i32 = arith.constant 16 : i32
    %7 = arith.muli %6, %c16_i32 : i32
    %8 = tpu.assume_multiple %7, 16 : i32
    %9 = arith.index_cast %8 : i32 to index
    %c0 = arith.constant 0 : index
    %10 = vector.load %arg2[%9, %c0] : memref<16x128xf32, #tpu.memory_space<vmem>>, vector<16x128xf32>
    %11 = arith.index_cast %8 : i32 to index
    %c0_4 = arith.constant 0 : index
    %12 = vector.load %arg3[%11, %c0_4] : memref<16x128xf32, #tpu.memory_space<vmem>>, vector<16x128xf32>
    %13 = math.log %10 : vector<16x128xf32>
    %cst = arith.constant -1.000000e+02 : f32
    %14 = vector.broadcast %cst : f32 to vector<16x128xf32>
    %15 = arith.maximumf %13, %14 : vector<16x128xf32>
    %cst_5 = arith.constant 1.000000e+00 : f32
    %16 = vector.broadcast %cst_5 : f32 to vector<16x128xf32>
    %17 = arith.subf %16, %10 : vector<16x128xf32>
    %18 = math.log %17 : vector<16x128xf32>
    %cst_6 = arith.constant -1.000000e+02 : f32
    %19 = vector.broadcast %cst_6 : f32 to vector<16x128xf32>
    %20 = arith.maximumf %18, %19 : vector<16x128xf32>
    %21 = arith.mulf %12, %15 : vector<16x128xf32>
    %cst_7 = arith.constant 1.000000e+00 : f32
    %22 = vector.broadcast %cst_7 : f32 to vector<16x128xf32>
    %23 = arith.subf %22, %12 : vector<16x128xf32>
    %24 = arith.mulf %23, %20 : vector<16x128xf32>
    %25 = arith.addf %21, %24 : vector<16x128xf32>
    %cst_8 = arith.constant 0.000000e+00 : f32
    %26 = vector.broadcast %cst_8 : f32 to vector<16x128xf32>
    %27 = arith.subf %26, %25 : vector<16x128xf32>
    %cst_9 = arith.constant 0.000000e+00 : f32
    %28 = vector.broadcast %cst_9 : f32 to vector<16x128xf32>
    %29 = arith.subf %28, %27 : vector<16x128xf32>
    %30 = math.exp %29 : vector<16x128xf32>
    %cst_10 = arith.constant 1.000000e+00 : f32
    %31 = vector.broadcast %cst_10 : f32 to vector<16x128xf32>
    %32 = arith.subf %31, %30 : vector<16x128xf32>
    %33 = arith.mulf %32, %32 : vector<16x128xf32>
    %34 = arith.mulf %33, %27 : vector<16x128xf32>
    %c16_i32_11 = arith.constant 16 : i32
    %35 = arith.muli %1, %c16_i32_11 : i32
    %36 = arith.addi %35, %8 : i32
    %c16_i32_12 = arith.constant 16 : i32
    %37 = arith.addi %36, %c16_i32_12 : i32
    %c16_i32_13 = arith.constant 16 : i32
    %38 = arith.cmpi sgt, %37, %c16_i32_13 : i32
    %true = arith.constant true
    %39 = arith.xori %38, %true : i1
    %40 = arith.extui %39 : i1 to i32
    %c0_i32_14 = arith.constant 0 : i32
    %41 = arith.cmpi ne, %40, %c0_i32_14 : i32
    scf.if %41 {
      %c0_19 = arith.constant 0 : index
      %c0_20 = arith.constant 0 : index
      %47 = vector.load %arg5[%c0_19, %c0_20] : memref<8x128xf32, #tpu.memory_space<vmem>>, vector<8x128xf32>
      %48 = vector.shape_cast %34 : vector<16x128xf32> to vector<2x8x128xf32>
      %cst_21 = arith.constant dense<0.000000e+00> : vector<8x128xf32>
      %49 = vector.multi_reduction <add>, %48, %cst_21 [0] : vector<2x8x128xf32> to vector<8x128xf32>
      %50 = arith.addf %47, %49 : vector<8x128xf32>
      %c0_22 = arith.constant 0 : index
      %c0_23 = arith.constant 0 : index
      %51 = vector.load %arg5[%c0_22, %c0_23] : memref<8x128xf32, #tpu.memory_space<vmem>>, vector<8x128xf32>
      tpu.vector_store %arg5[%c0_22, %c0_23], %50 {strides = array<i32>} : memref<8x128xf32, #tpu.memory_space<vmem>>, vector<8x128xf32>,
    } else {
    }
    %42 = arith.extui %38 : i1 to i32
    %c0_i32_15 = arith.constant 0 : i32
    %43 = arith.cmpi ne, %42, %c0_i32_15 : i32
    scf.if %43 {
      %47 = tpu.iota {dimensions = array<i32: 0>} : vector<16x128xi32>
      %48 = vector.broadcast %36 : i32 to vector<16x128xi32>
      %49 = arith.addi %48, %47 : vector<16x128xi32>
      %c16_i32_19 = arith.constant 16 : i32
      %50 = vector.broadcast %c16_i32_19 : i32 to vector<16x128xi32>
      %51 = arith.cmpi slt, %49, %50 : vector<16x128xi32>
      %cst_20 = arith.constant 0.000000e+00 : f32
      %52 = vector.broadcast %cst_20 : f32 to vector<16x128xf32>
      %53 = arith.select %51, %34, %52 : vector<16x128xi1>, vector<16x128xf32>
      %c0_21 = arith.constant 0 : index
      %c0_22 = arith.constant 0 : index
      %54 = vector.load %arg5[%c0_21, %c0_22] : memref<8x128xf32, #tpu.memory_space<vmem>>, vector<8x128xf32>
      %55 = vector.shape_cast %53 : vector<16x128xf32> to vector<2x8x128xf32>
      %cst_23 = arith.constant dense<0.000000e+00> : vector<8x128xf32>
      %56 = vector.multi_reduction <add>, %55, %cst_23 [0] : vector<2x8x128xf32> to vector<8x128xf32>
      %57 = arith.addf %54, %56 : vector<8x128xf32>
      %c0_24 = arith.constant 0 : index
      %c0_25 = arith.constant 0 : index
      %58 = vector.load %arg5[%c0_24, %c0_25] : memref<8x128xf32, #tpu.memory_space<vmem>>, vector<8x128xf32>
      tpu.vector_store %arg5[%c0_24, %c0_25], %57 {strides = array<i32>} : memref<8x128xf32, #tpu.memory_space<vmem>>, vector<8x128xf32>,
    } else {
    }
    %c1_i32_16 = arith.constant 1 : i32
    %c0_i32_17 = arith.constant 0 : i32
    %44 = arith.cmpi eq, %arg1, %c0_i32_17 : i32
    %45 = arith.extui %44 : i1 to i32
    %c0_i32_18 = arith.constant 0 : i32
    %46 = arith.cmpi ne, %45, %c0_i32_18 : i32
    scf.if %46 {
      %c0_19 = arith.constant 0 : index
      %c0_20 = arith.constant 0 : index
      %47 = vector.load %arg5[%c0_19, %c0_20] : memref<8x128xf32, #tpu.memory_space<vmem>>, vector<8x128xf32>
      %48 = vector.shape_cast %47 : vector<8x128xf32> to vector<1x8x128xf32>
      %cst_21 = arith.constant dense<0.000000e+00> : vector<1xf32>
      %49 = vector.multi_reduction <add>, %48, %cst_21 [1, 2] : vector<1x8x128xf32> to vector<1xf32>
      %50 = vector.shape_cast %49 : vector<1xf32> to vector<1x1x1xf32>
      %51 = vector.extract %50[0, 0, 0] : f32 from vector<1x1x1xf32>
      %c0_22 = arith.constant 0 : index
      %c0_23 = arith.constant 0 : index
      %52 = memref.load %arg4[%c0_22, %c0_23] : memref<1x1xf32, #tpu.memory_space<smem>>
      memref.store %51, %arg4[%c0_22, %c0_23] : memref<1x1xf32, #tpu.memory_space<smem>>
    } else {
    }
    return
  }
  func.func @transform_0(%arg0: i32, %arg1: i32) -> (i32, i32) {
    %c1_i32 = arith.constant 1 : i32
    %0 = arith.muli %arg0, %c1_i32 : i32
    %1 = arith.addi %0, %arg1 : i32
    %c0_i32 = arith.constant 0 : i32
    %2 = arith.minsi %1, %c0_i32 : i32
    %c0_i32_0 = arith.constant 0 : i32
    %c0_i32_1 = arith.constant 0 : i32
    return %2, %c0_i32_0 : i32, i32
  }
  func.func @transform_1(%arg0: i32, %arg1: i32) -> (i32, i32) {
    %c1_i32 = arith.constant 1 : i32
    %0 = arith.muli %arg0, %c1_i32 : i32
    %1 = arith.addi %0, %arg1 : i32
    %c0_i32 = arith.constant 0 : i32
    %2 = arith.minsi %1, %c0_i32 : i32
    %c0_i32_0 = arith.constant 0 : i32
    %c0_i32_1 = arith.constant 0 : i32
    return %2, %c0_i32_0 : i32, i32
  }
  func.func @transform_2(%arg0: i32, %arg1: i32) -> (i32, i32) {
    %c0_i32 = arith.constant 0 : i32
    %c0_i32_0 = arith.constant 0 : i32
    return %arg0, %c0_i32 : i32, i32
  }
}

</mosaic_0001>

<bundles_post_ra>
// kernel: tpu_custom_call.1
= control target key start
LH: loop header
LB: loop body
LE: loop exit
PB: predicated region body
PF: predicated region fallthrough
CT: control target
= control target key end

     0   :  { %7 = vsyncpa [#allocation4], 0  ;;  %s271_s0 = inlined_call_operand.hbm [shape: f32[16,128], index: 0, kind: input, shape index: {}]   ;;  %s272_s1 = inlined_call_operand.hbm [shape: f32[16,128], index: 1, kind: input, shape index: {}]   ;;  %s273_s2 = inlined_call_operand.hbm [shape: f32[1,1], index: 2, kind: output, shape index: {}]  }
   0x1   :  { %8 = vsyncpa [#allocation7], 0 }
   0x2   :  { %9 = vsyncpa [#allocation5], 0  ;;  %s242_s9 = smov [#allocation3]  }
   0x3   :  { %s21_s10 = sshll.u32 %s242_s9, 4  ;;  %s22_s10 = int_to_ptr.vmem [resolvable:$true] %s21_s10 }
   0x4   :  { %s196_s11 = scalar_lea.vmem %s22_s10, 256  ;;  %p201_p1 = scmp.lt.s32.totalorder %s22_s10, %s22_s10 }
   0x5   :  { %p197_p0 = scmp.ne.s32.totalorder %s22_s10, %s196_s11  ;;  %p202_p2 = scmp.lt.s32.totalorder %s196_s11, %s196_s11 }
   0x7   :  { %p203_p3 = por %p202_p2, %p201_p1 }
   0x9   :  { %p204_p4 = pnand %p203_p3, %p197_p0 }
   0xb   :  { %207 = shalt.err (!%p204_p4)
}
   0xc   :  { %s243_s12 = smov 128   ;;  %s244_s13 = smov 8  }
   0xd   :  { %27 = dma.hbm_to_vmem [thread:$0]  %s271_s0, 256, %s22_s10, [#allocation4], %s243_s12, %s243_s12, %s244_s13  }
   0xe   :  { %s245_s16 = smov [#allocation6]  }
   0xf   :  { %s39_s17 = sshll.u32 %s245_s16, 4  ;;  %s40_s17 = int_to_ptr.vmem [resolvable:$true] %s39_s17 }
  0x10   :  { %s216_s18 = scalar_lea.vmem %s40_s17, 256  ;;  %p221_p6 = scmp.lt.s32.totalorder %s40_s17, %s40_s17 }
  0x11   :  { %p217_p5 = scmp.ne.s32.totalorder %s40_s17, %s216_s18  ;;  %p222_p7 = scmp.lt.s32.totalorder %s216_s18, %s216_s18 }
  0x13   :  { %p223_p8 = por %p222_p7, %p221_p6 }
  0x15   :  { %p224_p9 = pnand %p223_p8, %p217_p5 }
  0x17   :  { %227 = shalt.err (!%p224_p9)
}
  0x18   :  { %45 = dma.hbm_to_vmem [thread:$0]  %s272_s1, 256, %s40_s17, [#allocation7], %s243_s12, %s243_s12, %s244_s13  }
  0x19   :  { %236 = dma.done.wait [#allocation4], 256  }
  0x1a   :  { %237 = vsyncadd [#allocation4], 4294967040 }
  0x1b   :  { %238 = dma.done.wait [#allocation7], 256  }
  0x1c   :  { %239 = vsyncadd [#allocation7], 4294967040  ;;  %v66_v0 = vld [vmem:[#allocation3] sm:$0xff]  ;;  %v67_v1 = vld [vmem:[#allocation3 + $0x8] sm:$0xff]  ;;  %s246_s1 = smov [#allocation8]  }
  0x1d   :  { %176 = vlog2.f32 %v66_v0  ;;  %v76_v2 = vsub.f32 1.0, %v66_v0  ;;  %v77_v3 = vsub.f32 1.0, %v67_v1  ;;  %v68_v5 = vld [vmem:[#allocation6] sm:$0xff]  ;;  %v69_v7 = vld [vmem:[#allocation6 + $0x8] sm:$0xff] }
  0x1e   :  { %178 = vlog2.f32 %v67_v1  ;;  %v86_v14 = vsub.f32 1.0, %v68_v5  ;;  %v87_v17 = vsub.f32 1.0, %v69_v7 }
  0x1f   :  { %180 = vlog2.f32 %v76_v2 }
  0x20   :  { %182 = vlog2.f32 %v77_v3 }
  0x2a   :  { %v177_v4 = vpop.eup %176 }
  0x2b   :  { %v179_v6 = vpop.eup %178  ;;  %v71_v8 = vmul.f32 0.6931472, %v177_v4 }
  0x2c   :  { %v181_v9 = vpop.eup %180  ;;  %v73_v10 = vmul.f32 0.6931472, %v179_v6 }
  0x2d   :  { %v183_v11 = vpop.eup %182  ;;  %v74_v12 = vmax.f32 %v71_v8, -100.0  ;;  %v79_v13 = vmul.f32 0.6931472, %v181_v9 }
  0x2e   :  { %v75_v15 = vmax.f32 %v73_v10, -100.0  ;;  %v81_v16 = vmul.f32 0.6931472, %v183_v11 }
  0x2f   :  { %v82_v18 = vmax.f32 %v79_v13, -100.0  ;;  %v84_v19 = vmul.f32 %v74_v12, %v68_v5 }
  0x30   :  { %v83_v20 = vmax.f32 %v81_v16, -100.0  ;;  %v85_v21 = vmul.f32 %v75_v15, %v69_v7 }
  0x31   :  { %v88_v22 = vmul.f32 %v86_v14, %v82_v18 }
  0x32   :  { %v89_v23 = vmul.f32 %v87_v17, %v83_v20 }
  0x33   :  { %v90_v24 = vadd.f32 %v88_v22, %v84_v19 }
  0x34   :  { %v91_v25 = vadd.f32 %v89_v23, %v85_v21 }
  0x35   :  { %v92_v26 = vsub.f32 0.0, %v90_v24 }
  0x36   :  { %v93_v27 = vsub.f32 0.0, %v91_v25 }
  0x37   :  { %v94_v28 = vsub.f32 0.0, %v92_v26 }
  0x38   :  { %v95_v29 = vsub.f32 0.0, %v93_v27 }
  0x39   :  { %v96_v30 = vmul.f32 1.442695, %v94_v28 }
  0x3a   :  { %v98_v31 = vmul.f32 1.442695, %v95_v29 }
  0x3b   :  { %184 = vpow2.f32 %v96_v30 }
  0x3c   :  { %186 = vpow2.f32 %v98_v31 }
  0x48   :  { %v185_v32 = vpop.eup %184 }
  0x49   :  { %v187_v33 = vpop.eup %186  ;;  %v100_v34 = vsub.f32 1.0, %v185_v32 }
  0x4a   :  { %v101_v35 = vsub.f32 1.0, %v187_v33 }
  0x4b   :  { %v102_v36 = vmul.f32 %v100_v34, %v100_v34 }
  0x4c   :  { %v103_v37 = vmul.f32 %v101_v35, %v101_v35 }
  0x4d   :  { %v104_v38 = vmul.f32 %v102_v36, %v92_v26 }
  0x4e   :  { %v105_v39 = vmul.f32 %v103_v37, %v93_v27 }
  0x50   :  { %v115_v40 = vadd.f32 %v105_v39, %v104_v38 }
  0x52   :  { %139 = vadd.xlane.f32.xlu0 %v115_v40 }
  0xdb   :  { %v140_v41 = vpop.xlane.xlu0 %139 }
  0xdc   :  { %v141_v42 = vrot.slane %v140_v41, 4 }
  0xde   :  { %v142_v43 = vadd.f32 %v141_v42, %v140_v41 }
  0xe0   :  { %v143_v44 = vrot.slane %v142_v43, 2 }
  0xe2   :  { %v144_v45 = vadd.f32 %v143_v44, %v142_v43 }
  0xe4   :  { %v145_v46 = vrot.slane %v144_v45, 1 }
  0xe6   :  { %v146_v47 = vadd.f32 %v145_v46, %v144_v45 }
  0xe8   :  { %169 = vpush %v146_v47 }
 0x119   :  { %s170_s0 = spop %169 }
 0x11a   :  { %149 = sst [smem:[#allocation8]] %s170_s0 }
 0x11b   :  { %157 = dma.smem_to_hbm %s246_s1, 16, %s273_s2, [#allocation5]  }
 0x11c   :  { %240 = dma.done.wait [#allocation5], 16  }
 0x11d   :  { %241 = vsyncadd [#allocation5], 4294967280 }
 0x11e   :  { %161 = sfence }
 0x11f   :  { %162 = vsyncpa [#allocation4], 1 }
 0x120   :  { %163 = vsyncpa [#allocation7], 1 }
 0x121   :  { %164 = vsyncpa [#allocation5], 1 }

</bundles_post_ra>
